<compile_context>
chip_gen: v6e
topology: v6e:2x2x1
jax: 0.10.0
libtpu: 0.0.40
codegen_flags: <defaults>
</compile_context>

<pallas_src>
import functools

import jax
import jax.numpy as jnp
from jax.experimental import pallas as pl
from jax.experimental.pallas import tpu as pltpu


def _round_up(n, m):
    return ((n + m - 1) // m) * m


def _policy_mlp_kernel(x_ref, w1_ref, b1_ref, w2_ref, b2_ref, w3_ref, b3_ref,
                       o_ref, *, layer1_on_vpu):
    x = x_ref[...]                                    # (tb, state_dim) f32

    # ---- Layer 1: Linear(state_dim, 128) + ReLU ----------------------------
    if layer1_on_vpu:
        # MXU time scales with streamed LHS rows, not K, so the K=8 layer
        # costs ~as many vmatmul pushes as a 128-wide one.  If the MXU slot
        # is the binding unit, do it as K broadcast FMAs on the VPU instead.
        h1 = b1_ref[...]                              # (1, 128) f32
        for k in range(x_ref.shape[-1]):              # static unroll, K = 8
            h1 = h1 + x[:, k:k + 1] * w1_ref[k:k + 1, :]
    else:
        h1 = jnp.dot(x, w1_ref[...],
                     preferred_element_type=jnp.float32) + b1_ref[...]
    h1 = jnp.maximum(h1, 0.0)

    # ---- Layer 2: Linear(128, 128) + ReLU (MXU, f32 accumulate) ------------
    h2 = jnp.dot(h1.astype(w2_ref.dtype), w2_ref[...],
                 preferred_element_type=jnp.float32) + b2_ref[...]
    h2 = jnp.maximum(h2, 0.0)

    # ---- Layer 3: Linear(128, out_pad). Padded columns have weight 0 and ---
    # bias -1e9 (finite in f32/bf16), so exp underflows to exactly 0 there.
    logits = jnp.dot(h2.astype(w3_ref.dtype), w3_ref[...],
                     preferred_element_type=jnp.float32) + b3_ref[...]

    # Numerically-stable softmax over the lane-dense (padded) width.
    # Exact normalization: each row sums to 1 within f32 rounding.
    m = jnp.max(logits, axis=-1, keepdims=True)
    e = jnp.exp(logits - m)
    s = jnp.sum(e, axis=-1, keepdims=True)
    probs = e / s

    # Narrow store: only the real action_dim lanes go back to HBM.
    adim = o_ref.shape[-1]
    o_ref[...] = probs[:, :adim].astype(o_ref.dtype)


@functools.partial(jax.jit, static_argnames=("block_b", "weight_dtype",
                                             "out_dtype", "layer1_on_vpu"))
def policy_network_forward(x, params, *, block_b=4096,
                           weight_dtype=jnp.bfloat16,
                           out_dtype=jnp.float32,
                           layer1_on_vpu=False):
    """x: [B, state_dim] float32 -> probs [B, action_dim] (out_dtype).

    weight_dtype=jnp.bfloat16 (default) casts the two 128-wide weight matrices
    to bf16 for the MXU (f32 accumulation kept); pass None for pure f32.
    out_dtype=jnp.bfloat16 halves the (already narrow) output writeback.
    """
    w1, b1, w2, b2, w3, b3 = params
    B, state_dim = x.shape
    hidden = w1.shape[1]
    action_dim = w3.shape[1]

    # ---- lane-dense layer-3 compute width (softmax runs over this) ---------
    out_pad = _round_up(action_dim, 128)
    w3p = jnp.zeros((hidden, out_pad), w3.dtype).at[:, :action_dim].set(w3)
    # Pad bias -1e9 stays representable in f32/bf16 and is far below any real
    # logit of this network -> zero probability mass on padded lanes.
    b3p = jnp.full((1, out_pad), -1e9, jnp.float32).at[:, :action_dim].set(b3)

    # bf16 for the two 128x128 MXU layers; layer-1 weights (~4 KB) and all
    # biases stay f32 (layer-1 MXU cost is row-bound, not dtype-bound).
    is_bf16 = (weight_dtype is not None
               and jnp.dtype(weight_dtype) == jnp.bfloat16)
    if weight_dtype is not None:
        w2 = w2.astype(weight_dtype)
        w3p = w3p.astype(weight_dtype)

    # ---- batch tiling -------------------------------------------------------
    # bf16 intermediates pack (16,128) sublanes -> align rows to 16 then.
    row_align = 16 if is_bf16 else 8

    b_eff = B
    if B < row_align:                      # host-side pad only for tiny batches
        x = jnp.pad(x, ((0, row_align - B), (0, 0)))
        b_eff = row_align

    tb = _round_up(min(block_b, b_eff), row_align)
    # Keep >= 2 grid steps when the batch allows so both v7x TCs get work.
    if b_eff >= 2 * row_align:
        tb = min(tb, _round_up(pl.cdiv(b_eff, 2), row_align))
    grid = (pl.cdiv(b_eff, tb),)           # ragged last block: OOB writes masked

    const2d = lambda i: (0, 0)             # weights/biases: one DMA, VMEM-resident
    # TODO(synk): pipeline_mode=pl.Buffered(1) on the constant-index blocks would
    # free ~135 KB of pointless double-buffer VMEM if Mosaic does not already.

    flops = 2 * b_eff * (state_dim * hidden + hidden * hidden + hidden * out_pad)
    bytes_accessed = (
        b_eff * state_dim * x.dtype.itemsize
        + sum(a.size * a.dtype.itemsize for a in (w1, b1, w2, b2, w3p, b3p))
        + b_eff * action_dim * jnp.dtype(out_dtype).itemsize)
    cost = pl.CostEstimate(flops=flops, transcendentals=b_eff * out_pad,
                           bytes_accessed=bytes_accessed)

    kernel = functools.partial(_policy_mlp_kernel, layer1_on_vpu=layer1_on_vpu)

    out = pl.pallas_call(
        kernel,
        out_shape=jax.ShapeDtypeStruct((b_eff, action_dim), out_dtype),
        grid=grid,
        in_specs=[
            pl.BlockSpec((tb, state_dim), lambda i: (i, 0)),  # x: batch-tiled
            pl.BlockSpec(w1.shape, const2d),                  # weights/biases:
            pl.BlockSpec(b1.shape, const2d),                  #  constant index_map,
            pl.BlockSpec(w2.shape, const2d),                  #  stay in VMEM across
            pl.BlockSpec(b2.shape, const2d),                  #  all grid steps
            pl.BlockSpec(w3p.shape, const2d),
            pl.BlockSpec(b3p.shape, const2d),
        ],
        out_specs=pl.BlockSpec((tb, action_dim), lambda i: (i, 0)),
        compiler_params=pltpu.CompilerParams(
            dimension_semantics=("parallel",),                # megacore sharding
            vmem_limit_bytes=48 * 1024 * 1024),               # v5e>16MiB, v7x<64MiB
        cost_estimate=cost,
    )(x, w1, b1, w2, b2, w3p, b3p)

    return out[:B] if b_eff != B else out


def init_params(key, state_dim, action_dim, hidden=128):
    """Deterministic init mimicking PyTorch nn.Linear (uniform +-1/sqrt(fan_in)).

    Weights stored [in, out]; biases [1, out] for clean 2D broadcasting.
    """
    ks = jax.random.split(key, 6)

    def linear(kw, kb, fan_in, fan_out):
        bound = float(fan_in) ** -0.5
        w = jax.random.uniform(kw, (fan_in, fan_out), jnp.float32, -bound, bound)
        b = jax.random.uniform(kb, (1, fan_out), jnp.float32, -bound, bound)
        return w, b

    w1, b1 = linear(ks[0], ks[1], state_dim, hidden)
    w2, b2 = linear(ks[2], ks[3], hidden, hidden)
    w3, b3 = linear(ks[4], ks[5], hidden, action_dim)
    return (w1, b1, w2, b2, w3, b3)


def reference_forward(x, params):
    """Pure-JAX reference of the PyTorch forward for correctness check."""
    w1, b1, w2, b2, w3, b3 = params
    h1 = jnp.maximum(x @ w1 + b1, 0.0)
    h2 = jnp.maximum(h1 @ w2 + b2, 0.0)
    logits = h2 @ w3 + b3
    return jax.nn.softmax(logits, axis=-1)


if __name__ == "__main__":
    key = jax.random.PRNGKey(0)
    k_params, k_x1, k_x2 = jax.random.split(key, 3)

    state_dim = 8      # boat observation vector
    action_dim = 4     # discrete rudder/throttle actions
    params = init_params(k_params, state_dim, action_dim)

    x_small = jax.random.normal(k_x1, (2, state_dim), jnp.float32)
    x_big = jax.random.normal(k_x2, (100, state_dim), jnp.float32)
    ref_small = reference_forward(x_small, params)
    ref_big = reference_forward(x_big, params)

    # 1) f32 path, spec-sized tiny batch: exact math -> tight tolerance.
    p = jax.block_until_ready(
        policy_network_forward(x_small, params, weight_dtype=None))
    assert p.shape == (2, action_dim)
    assert jnp.allclose(jnp.sum(p, axis=-1), 1.0, atol=1e-5)
    assert jnp.allclose(p, ref_small, atol=1e-5, rtol=1e-5)

    # 2) f32 path over a multi-step, ragged batch grid (100 rows, 32-row tiles).
    p = jax.block_until_ready(
        policy_network_forward(x_big, params, block_b=32, weight_dtype=None))
    assert p.shape == (100, action_dim)
    assert jnp.allclose(jnp.sum(p, axis=-1), 1.0, atol=1e-5)
    assert jnp.allclose(p, ref_big, atol=1e-5, rtol=1e-5)

    # 3) Default bf16-weight path (v6e/v7x MXU-native), tiny batch.
    p = jax.block_until_ready(policy_network_forward(x_small, params))
    assert p.shape == (2, action_dim)
    assert jnp.allclose(jnp.sum(p, axis=-1), 1.0, atol=1e-5)
    assert jnp.allclose(p, ref_small, atol=2e-2, rtol=2e-2)

    # 4) Default bf16-weight path over the ragged multi-step grid.
    p = jax.block_until_ready(
        policy_network_forward(x_big, params, block_b=32))
    assert p.shape == (100, action_dim)
    assert jnp.allclose(jnp.sum(p, axis=-1), 1.0, atol=1e-5)
    assert jnp.allclose(p, ref_big, atol=2e-2, rtol=2e-2)

    print("KERNEL_OK")
</pallas_src>

<mosaic_0001>
module attributes {stable_mosaic.version = 11 : i64} {
  func.func @_policy_mlp_kernel(%arg0: i32, %arg1: memref<8x8xf32, #tpu.memory_space<vmem>>, %arg2: memref<8x128xf32, #tpu.memory_space<vmem>>, %arg3: memref<1x128xf32, #tpu.memory_space<vmem>>, %arg4: memref<128x128xf32, #tpu.memory_space<vmem>>, %arg5: memref<1x128xf32, #tpu.memory_space<vmem>>, %arg6: memref<128x128xf32, #tpu.memory_space<vmem>>, %arg7: memref<1x128xf32, #tpu.memory_space<vmem>>, %arg8: memref<8x4xf32, #tpu.memory_space<vmem>>) attributes {dimension_semantics = [#tpu.dimension_semantics<parallel>], iteration_bounds = array<i64: 1>, scalar_prefetch = 0 : i64, scratch_operands = 0 : i64, tpu.core_type = #tpu.core_type<tc>, window_params = [{transform_indices = @transform_0, window_bounds = array<i64: 8, 8>}, {pipeline_mode = #tpu.pipeline_mode<synchronous>, transform_indices = @transform_1, window_bounds = array<i64: 8, 128>}, {pipeline_mode = #tpu.pipeline_mode<synchronous>, transform_indices = @transform_2, window_bounds = array<i64: 1, 128>}, {pipeline_mode = #tpu.pipeline_mode<synchronous>, transform_indices = @transform_3, window_bounds = array<i64: 128, 128>}, {pipeline_mode = #tpu.pipeline_mode<synchronous>, transform_indices = @transform_4, window_bounds = array<i64: 1, 128>}, {pipeline_mode = #tpu.pipeline_mode<synchronous>, transform_indices = @transform_5, window_bounds = array<i64: 128, 128>}, {pipeline_mode = #tpu.pipeline_mode<synchronous>, transform_indices = @transform_6, window_bounds = array<i64: 1, 128>}, {transform_indices = @transform_7, window_bounds = array<i64: 8, 4>}]} {
    %c0 = arith.constant 0 : index
    %c0_0 = arith.constant 0 : index
    %0 = vector.load %arg1[%c0, %c0_0] : memref<8x8xf32, #tpu.memory_space<vmem>>, vector<8x8xf32>
    %c0_1 = arith.constant 0 : index
    %c0_2 = arith.constant 0 : index
    %1 = vector.load %arg2[%c0_1, %c0_2] : memref<8x128xf32, #tpu.memory_space<vmem>>, vector<8x128xf32>
    %cst = arith.constant dense<0.000000e+00> : vector<8x128xf32>
    %2 = tpu.matmul %0, %1, %cst {dimension_numbers = #tpu.dot_dimension_numbers<[1], [0], [0], [1], [0, 0, 1, 1], [], []>} : vector<8x8xf32>, vector<8x128xf32>, vector<8x128xf32> -> vector<8x128xf32>
    %c0_3 = arith.constant 0 : index
    %c0_4 = arith.constant 0 : index
    %3 = vector.load %arg3[%c0_3, %c0_4] : memref<1x128xf32, #tpu.memory_space<vmem>>, vector<1x128xf32>
    %4 = vector.broadcast %3 : vector<1x128xf32> to vector<8x128xf32>
    %5 = arith.addf %2, %4 : vector<8x128xf32>
    %cst_5 = arith.constant 0.000000e+00 : f32
    %6 = vector.broadcast %cst_5 : f32 to vector<8x128xf32>
    %7 = arith.maximumf %5, %6 : vector<8x128xf32>
    %c0_6 = arith.constant 0 : index
    %c0_7 = arith.constant 0 : index
    %8 = vector.load %arg4[%c0_6, %c0_7] : memref<128x128xf32, #tpu.memory_space<vmem>>, vector<128x128xf32>
    %cst_8 = arith.constant dense<0.000000e+00> : vector<8x128xf32>
    %9 = tpu.matmul %7, %8, %cst_8 {dimension_numbers = #tpu.dot_dimension_numbers<[1], [0], [0], [1], [0, 0, 1, 1], [], []>} : vector<8x128xf32>, vector<128x128xf32>, vector<8x128xf32> -> vector<8x128xf32>
    %c0_9 = arith.constant 0 : index
    %c0_10 = arith.constant 0 : index
    %10 = vector.load %arg5[%c0_9, %c0_10] : memref<1x128xf32, #tpu.memory_space<vmem>>, vector<1x128xf32>
    %11 = vector.broadcast %10 : vector<1x128xf32> to vector<8x128xf32>
    %12 = arith.addf %9, %11 : vector<8x128xf32>
    %cst_11 = arith.constant 0.000000e+00 : f32
    %13 = vector.broadcast %cst_11 : f32 to vector<8x128xf32>
    %14 = arith.maximumf %12, %13 : vector<8x128xf32>
    %c0_12 = arith.constant 0 : index
    %c0_13 = arith.constant 0 : index
    %15 = vector.load %arg6[%c0_12, %c0_13] : memref<128x128xf32, #tpu.memory_space<vmem>>, vector<128x128xf32>
    %cst_14 = arith.constant dense<0.000000e+00> : vector<8x128xf32>
    %16 = tpu.matmul %14, %15, %cst_14 {dimension_numbers = #tpu.dot_dimension_numbers<[1], [0], [0], [1], [0, 0, 1, 1], [], []>} : vector<8x128xf32>, vector<128x128xf32>, vector<8x128xf32> -> vector<8x128xf32>
    %c0_15 = arith.constant 0 : index
    %c0_16 = arith.constant 0 : index
    %17 = vector.load %arg7[%c0_15, %c0_16] : memref<1x128xf32, #tpu.memory_space<vmem>>, vector<1x128xf32>
    %18 = vector.broadcast %17 : vector<1x128xf32> to vector<8x128xf32>
    %19 = arith.addf %16, %18 : vector<8x128xf32>
    %cst_17 = arith.constant dense<0xFF800000> : vector<8xf32>
    %20 = vector.multi_reduction <maximumf>, %19, %cst_17 [1] : vector<8x128xf32> to vector<8xf32>
    %21 = vector.shape_cast %20 : vector<8xf32> to vector<8x1xf32>
    %22 = vector.broadcast %21 : vector<8x1xf32> to vector<8x128xf32>
    %23 = arith.subf %19, %22 : vector<8x128xf32>
    %24 = math.exp %23 : vector<8x128xf32>
    %cst_18 = arith.constant dense<0.000000e+00> : vector<8xf32>
    %25 = vector.multi_reduction <add>, %24, %cst_18 [1] : vector<8x128xf32> to vector<8xf32>
    %26 = vector.shape_cast %25 : vector<8xf32> to vector<8x1xf32>
    %27 = vector.broadcast %26 : vector<8x1xf32> to vector<8x128xf32>
    %28 = arith.divf %24, %27 : vector<8x128xf32>
    %29 = vector.extract_strided_slice %28 {offsets = [0, 0], sizes = [8, 4], strides = [1, 1]} : vector<8x128xf32> to vector<8x4xf32>
    %c0_19 = arith.constant 0 : index
    %c0_20 = arith.constant 0 : index
    %30 = vector.load %arg8[%c0_19, %c0_20] : memref<8x4xf32, #tpu.memory_space<vmem>>, vector<8x4xf32>
    tpu.vector_store %arg8[%c0_19, %c0_20], %29 {strides = array<i32>} : memref<8x4xf32, #tpu.memory_space<vmem>>, vector<8x4xf32>,
    return
  }
  func.func @transform_0(%arg0: i32) -> (i32, i32) {
    %c0_i32 = arith.constant 0 : i32
    %c0_i32_0 = arith.constant 0 : i32
    return %arg0, %c0_i32 : i32, i32
  }
  func.func @transform_1(%arg0: i32) -> (i32, i32) {
    %c0_i32 = arith.constant 0 : i32
    %c0_i32_0 = arith.constant 0 : i32
    %c0_i32_1 = arith.constant 0 : i32
    return %c0_i32, %c0_i32_0 : i32, i32
  }
  func.func @transform_2(%arg0: i32) -> (i32, i32) {
    %c0_i32 = arith.constant 0 : i32
    %c0_i32_0 = arith.constant 0 : i32
    %c0_i32_1 = arith.constant 0 : i32
    return %c0_i32, %c0_i32_0 : i32, i32
  }
  func.func @transform_3(%arg0: i32) -> (i32, i32) {
    %c0_i32 = arith.constant 0 : i32
    %c0_i32_0 = arith.constant 0 : i32
    %c0_i32_1 = arith.constant 0 : i32
    return %c0_i32, %c0_i32_0 : i32, i32
  }
  func.func @transform_4(%arg0: i32) -> (i32, i32) {
    %c0_i32 = arith.constant 0 : i32
    %c0_i32_0 = arith.constant 0 : i32
    %c0_i32_1 = arith.constant 0 : i32
    return %c0_i32, %c0_i32_0 : i32, i32
  }
  func.func @transform_5(%arg0: i32) -> (i32, i32) {
    %c0_i32 = arith.constant 0 : i32
    %c0_i32_0 = arith.constant 0 : i32
    %c0_i32_1 = arith.constant 0 : i32
    return %c0_i32, %c0_i32_0 : i32, i32
  }
  func.func @transform_6(%arg0: i32) -> (i32, i32) {
    %c0_i32 = arith.constant 0 : i32
    %c0_i32_0 = arith.constant 0 : i32
    %c0_i32_1 = arith.constant 0 : i32
    return %c0_i32, %c0_i32_0 : i32, i32
  }
  func.func @transform_7(%arg0: i32) -> (i32, i32) {
    %c0_i32 = arith.constant 0 : i32
    %c0_i32_0 = arith.constant 0 : i32
    return %arg0, %c0_i32 : i32, i32
  }
}

</mosaic_0001>

<bundles_post_ra>
// kernel: policy_network_forward.1
= control target key start
LH: loop header
LB: loop body
LE: loop exit
PB: predicated region body
PF: predicated region fallthrough
CT: control target
= control target key end

     0   :  { %vm35_vm0 = vcmask 64512   ;;  %v433_v0 = vmov 0.0   ;;  %vm434_vm1 = vmmov 0   ;;  %vm306_vm2 = vcmask 31744   ;;  %s628_s1 = inlined_call_operand.vmem [shape: f32[8,128], index: 1, kind: input, shape index: {}]   ;;  %s629_s0 = inlined_call_operand.vmem [shape: f32[8,8], index: 0, kind: input, shape index: {}]   ;;  %s630_s3 = inlined_call_operand.vmem [shape: f32[128,128], index: 3, kind: input, shape index: {}]   ;;  %s631_s5 = inlined_call_operand.vmem [shape: f32[128,128], index: 5, kind: input, shape index: {}]   ;;  %s632_s2 = inlined_call_operand.vmem [shape: f32[1,128], index: 2, kind: input, shape index: {}]   ;;  %s633_s4 = inlined_call_operand.vmem [shape: f32[1,128], index: 4, kind: input, shape index: {}]   ;;  %s634_s6 = inlined_call_operand.vmem [shape: f32[1,128], index: 6, kind: input, shape index: {}]   ;;  %s635_s7 = inlined_call_operand.vmem [shape: f32[8,4], index: 7, kind: output, shape index: {}]  }
   0x1   :  { %352 = vmatprep.subr.mxu0 %v433_v0  ;;  %v27_v1 = vld [vmem:[%s628_s1] sm:$0xff]  ;;  %354 = vmatprep.mubr.msk.f32.mxu0 %vm434_vm1, %v433_v0  ;;  %v125_v3 = vld [vmem:[%s630_s3 + $0x78] sm:$0xff]  ;;  %v124_v4 = vld [vmem:[%s630_s3 + $0x70] sm:$0xff] }
   0x2   :  { %v26_v2 = vld [vmem:[%s629_s0] sm:$0xff]  ;;  %353 = vmatpush3.msra.mxu0 %v27_v1  ;;  %357 = vmatprep.subr.mxu1 %v433_v0  ;;  %v123_v5 = vld [vmem:[%s630_s3 + $0x68] sm:$0xff]  ;;  %v121_v7 = vld [vmem:[%s630_s3 + $0x58] sm:$0xff] }
   0x3   :  { %355 = vmatmul.mubr.msk.f32.vlgmr.msra.gmra.mxu0 %vm35_vm0, %v26_v2  ;;  %358 = vmatpush3.msra.mxu1 %v125_v3  ;;  %v122_v6 = vld [vmem:[%s630_s3 + $0x60] sm:$0xff]  ;;  %v120_v8 = vld [vmem:[%s630_s3 + $0x50] sm:$0xff]  ;;  %v119_v9 = vld [vmem:[%s630_s3 + $0x48] sm:$0xff] }
   0x4   :  { %359 = vmatprep.subr.mxu1 %v433_v0  ;;  %389 = vmatprep.mubr.msk.f32.mxu1 %vm434_vm1, %v433_v0  ;;  %v118_v10 = vld [vmem:[%s630_s3 + $0x40] sm:$0xff]  ;;  %v117_v11 = vld [vmem:[%s630_s3 + $0x38] sm:$0xff]  ;;  %v116_v12 = vld [vmem:[%s630_s3 + $0x30] sm:$0xff] }
   0x5   :  { %360 = vmatpush3.msra.mxu1 %v124_v4  ;;  %392 = vmatprep.subr.mxu0 %v433_v0  ;;  %v115_v13 = vld [vmem:[%s630_s3 + $0x28] sm:$0xff]  ;;  %v114_v14 = vld [vmem:[%s630_s3 + $0x20] sm:$0xff]  ;;  %v113_v15 = vld [vmem:[%s630_s3 + $0x18] sm:$0xff] }
   0x6   :  { %361 = vmatprep.subr.mxu1 %v433_v0  ;;  %424 = vmatprep.mubr.msk.f32.mxu0 %vm434_vm1, %v433_v0  ;;  %v112_v16 = vld [vmem:[%s630_s3 + $0x10] sm:$0xff]  ;;  %v111_v17 = vld [vmem:[%s630_s3 + $0x8] sm:$0xff]  ;;  %v110_v18 = vld [vmem:[%s630_s3] sm:$0xff] }
   0x7   :  { %362 = vmatpush3.msra.mxu1 %v123_v5  ;;  %v219_v19 = vld [vmem:[%s631_s5 + $0x78] sm:$0xff]  ;;  %v218_v20 = vld [vmem:[%s631_s5 + $0x70] sm:$0xff]  ;;  %v217_v21 = vld [vmem:[%s631_s5 + $0x68] sm:$0xff] }
   0x8   :  { %363 = vmatprep.subr.mxu1 %v433_v0  ;;  %393 = vmatpush3.msra.mxu0 %v219_v19  ;;  %v216_v22 = vld [vmem:[%s631_s5 + $0x60] sm:$0xff]  ;;  %v215_v23 = vld [vmem:[%s631_s5 + $0x58] sm:$0xff]  ;;  %v214_v24 = vld [vmem:[%s631_s5 + $0x50] sm:$0xff] }
   0x9   :  { %364 = vmatpush3.msra.mxu1 %v122_v6  ;;  %394 = vmatprep.subr.mxu0 %v433_v0  ;;  %v213_v25 = vld [vmem:[%s631_s5 + $0x48] sm:$0xff]  ;;  %v212_v26 = vld [vmem:[%s631_s5 + $0x40] sm:$0xff]  ;;  %v211_v27 = vld [vmem:[%s631_s5 + $0x38] sm:$0xff] }
   0xa   :  { %365 = vmatprep.subr.mxu1 %v433_v0  ;;  %395 = vmatpush3.msra.mxu0 %v218_v20  ;;  %v210_v28 = vld [vmem:[%s631_s5 + $0x30] sm:$0xff]  ;;  %v209_v29 = vld [vmem:[%s631_s5 + $0x28] sm:$0xff]  ;;  %v208_v30 = vld [vmem:[%s631_s5 + $0x20] sm:$0xff] }
   0xb   :  { %366 = vmatpush3.msra.mxu1 %v121_v7  ;;  %396 = vmatprep.subr.mxu0 %v433_v0  ;;  %v207_v31 = vld [vmem:[%s631_s5 + $0x18] sm:$0xff]  ;;  %v312_v32 = vld [vmem:[%s632_s2] ss:$0 sm:$0xff]  ;;  %v206_v37 = vld [vmem:[%s631_s5 + $0x10] sm:$0xff] }
   0xc   :  { %367 = vmatprep.subr.mxu1 %v433_v0  ;;  %397 = vmatpush3.msra.mxu0 %v217_v21  ;;  %v205_v38 = vld [vmem:[%s631_s5 + $0x8] sm:$0xff]  ;;  %v204_v39 = vld [vmem:[%s631_s5] sm:$0xff] }
   0xd   :  { %368 = vmatpush3.msra.mxu1 %v120_v8  ;;  %398 = vmatprep.subr.mxu0 %v433_v0  ;;  %v314_v40 = vld [vmem:[%s633_s4] ss:$0 sm:$0xff] }
   0xe   :  { %369 = vmatprep.subr.mxu1 %v433_v0  ;;  %399 = vmatpush3.msra.mxu0 %v216_v22  ;;  %v315_v45 = vld [vmem:[%s634_s6] ss:$0 sm:$0xff] }
   0xf   :  { %370 = vmatpush3.msra.mxu1 %v119_v9  ;;  %400 = vmatprep.subr.mxu0 %v433_v0 }
  0x10   :  { %371 = vmatprep.subr.mxu1 %v433_v0  ;;  %401 = vmatpush3.msra.mxu0 %v215_v23 }
  0x11   :  { %372 = vmatpush3.msra.mxu1 %v118_v10  ;;  %402 = vmatprep.subr.mxu0 %v433_v0 }
  0x12   :  { %373 = vmatprep.subr.mxu1 %v433_v0  ;;  %403 = vmatpush3.msra.mxu0 %v214_v24 }
  0x13   :  { %374 = vmatpush3.msra.mxu1 %v117_v11  ;;  %404 = vmatprep.subr.mxu0 %v433_v0 }
  0x14   :  { %375 = vmatprep.subr.mxu1 %v433_v0  ;;  %405 = vmatpush3.msra.mxu0 %v213_v25 }
  0x15   :  { %376 = vmatpush3.msra.mxu1 %v116_v12  ;;  %406 = vmatprep.subr.mxu0 %v433_v0 }
  0x16   :  { %377 = vmatprep.subr.mxu1 %v433_v0  ;;  %407 = vmatpush3.msra.mxu0 %v212_v26 }
  0x17   :  { %378 = vmatpush3.msra.mxu1 %v115_v13  ;;  %408 = vmatprep.subr.mxu0 %v433_v0 }
  0x18   :  { %379 = vmatprep.subr.mxu1 %v433_v0  ;;  %409 = vmatpush3.msra.mxu0 %v211_v27 }
  0x19   :  { %380 = vmatpush3.msra.mxu1 %v114_v14  ;;  %410 = vmatprep.subr.mxu0 %v433_v0 }
  0x1a   :  { %381 = vmatprep.subr.mxu1 %v433_v0  ;;  %411 = vmatpush3.msra.mxu0 %v210_v28 }
  0x1b   :  { %382 = vmatpush3.msra.mxu1 %v113_v15  ;;  %412 = vmatprep.subr.mxu0 %v433_v0 }
  0x1c   :  { %383 = vmatprep.subr.mxu1 %v433_v0  ;;  %413 = vmatpush3.msra.mxu0 %v209_v29 }
  0x1d   :  { %384 = vmatpush3.msra.mxu1 %v112_v16  ;;  %414 = vmatprep.subr.mxu0 %v433_v0 }
  0x1e   :  { %385 = vmatprep.subr.mxu1 %v433_v0  ;;  %415 = vmatpush3.msra.mxu0 %v208_v30 }
  0x1f   :  { %386 = vmatpush3.msra.mxu1 %v111_v17  ;;  %416 = vmatprep.subr.mxu0 %v433_v0 }
  0x20   :  { %387 = vmatprep.subr.mxu1 %v433_v0  ;;  %417 = vmatpush3.msra.mxu0 %v207_v31 }
  0x21   :  { %388 = vmatpush3.msra.mxu1 %v110_v18  ;;  %418 = vmatprep.subr.mxu0 %v433_v0 }
  0x22   :  { %419 = vmatpush3.msra.mxu0 %v206_v37 }
  0x23   :  { %420 = vmatprep.subr.mxu0 %v433_v0 }
  0x24   :  { %421 = vmatpush3.msra.mxu0 %v205_v38 }
  0x25   :  { %422 = vmatprep.subr.mxu0 %v433_v0 }
  0x26   :  { %423 = vmatpush3.msra.mxu0 %v204_v39 }
  0xc3   :  { %v105_v33 = vpop.f32.mrf.mxu0 }
  0xc4   :  { %v106_v34 = vadd.f32 %v312_v32, %v105_v33 }
  0xc5   :  { %v356_v35 = vpop.f32.mrf.mxu0 }
  0xc6   :  { %v109_v36 = vmax.f32 %v106_v34, 0.0 }
  0xc8   :  { %390 = vmatmul.mubr.f32.vlgmr.msra.gmra.mxu1 %v109_v36 }
 0x188   :  { %v199_v41 = vpop.f32.mrf.mxu1 }
 0x189   :  { %v200_v42 = vadd.f32 %v314_v40, %v199_v41 }
 0x18a   :  { %v391_v43 = vpop.f32.mrf.mxu1 }
 0x18b   :  { %v203_v44 = vmax.f32 %v200_v42, 0.0 }
 0x18d   :  { %425 = vmatmul.mubr.f32.vlgmr.msra.gmra.mxu0 %v203_v44 }
 0x24d   :  { %v293_v46 = vpop.f32.mrf.mxu0 }
 0x24e   :  { %v294_v47 = vadd.f32 %v315_v45, %v293_v46 }
 0x24f   :  { %v426_v48 = vpop.f32.mrf.mxu0 }
 0x250   :  { %297 = vmax.xlane.f32.xlu0 %v294_v47 }
 0x2d9   :  { %v298_v49 = vpop.xlane.xlu0 %297 }
 0x2da   :  { %v299_v50 = vsub.f32 %v294_v47, %v298_v49 }
 0x2dc   :  { %v300_v51 = vmul.f32 1.442695, %v299_v50 }
 0x2de   :  { %429 = vpow2.f32 %v300_v51 }
 0x2eb   :  { %v430_v52 = vpop.eup %429 }
 0x2ec   :  { %302 = vadd.xlane.f32.xlu0 %v430_v52 }
 0x375   :  { %v303_v53 = vpop.xlane.xlu0 %302 }
 0x376   :  { %431 = vrcp.f32 %v303_v53 }
 0x383   :  { %v432_v54 = vpop.eup %431 }
 0x384   :  { %v305_v55 = vmul.f32 %v432_v54, %v430_v52 }
 0x386   :  { %307 = vst.msk [vmem:[%s635_s7] sm:$0xff] %vm306_vm2, %v305_v55 }

</bundles_post_ra>
